<compile_context>
chip_gen: v7x
topology: tpu7x:2x2x1
jax: 0.10.0
libtpu: 0.0.40
codegen_flags: <defaults>
</compile_context>

<pallas_src>
import functools

import jax
import jax.numpy as jnp
from jax.experimental import pallas as pl
from jax.experimental.pallas import tpu as pltpu


def _custom_div_kernel(x_ref, o_ref, *, eps):
    # x_ref block: (1, 4, T) ; o_ref block: (1, 3, T)
    # Compute in f32 (bf16/fp16 stay on the wire, but eps=1e-6 would underflow
    # a bf16 add); exact divide -- the kernel is HBM-bound, divide is hidden.
    x = x_ref[...].astype(jnp.float32)
    num = x[:, 0:1, :]                       # (1, 1, T)
    denom = x[:, 1:4, :]                     # (1, 3, T)
    o_ref[...] = (num / (denom + eps)).astype(o_ref.dtype)


def custom_div(x, eps, *, tile=65536, use_pallas=None):
    """num, denom = split(x, [1, 3], axis=1); return num / (denom + eps)."""
    B, C, H, W = x.shape
    assert C == 4, "CustomDiv expects 4 input channels (1 num + 3 denom)"
    N = H * W

    # Small-input fallback: a standalone pallas_call forces an HBM round trip
    # plus launch overhead; for tiny inputs let XLA fuse the divide for free.
    if use_pallas is None:
        use_pallas = (B * N) >= 65536
    if not use_pallas:
        return x[:, 0:1] / (x[:, 1:4] + eps)

    # Tile selection:
    #  * lane-dense (multiple of 128) along the flattened spatial axis,
    #  * capped at `tile` (~1 MiB per input buffer) -- HBM saturates long
    #    before VMEM capacity matters on any generation,
    #  * floored so B * n_tiles >= ~8 grid iterations (v7x megacore + deep
    #    double-buffering even when B is 1-2).
    min_tiles = max(1, -(-8 // B))                   # ceil(8 / B)
    T = min(int(tile), -(-N // min_tiles))           # cdiv(N, min_tiles)
    T = max(128, ((T + 127) // 128) * 128)
    n_tiles = pl.cdiv(N, T)                          # ragged last block is
                                                     # clipped by Pallas

    xf = x.reshape(B, C, N)                          # free (contiguous)
    kernel = functools.partial(_custom_div_kernel, eps=float(eps))
    out_flat = pl.pallas_call(
        kernel,
        out_shape=jax.ShapeDtypeStruct((B, 3, N), x.dtype),
        grid=(B, n_tiles),
        in_specs=[pl.BlockSpec((1, 4, T), lambda b, t: (b, 0, t))],
        out_specs=pl.BlockSpec((1, 3, T), lambda b, t: (b, 0, t)),
        compiler_params=pltpu.CompilerParams(
            dimension_semantics=("parallel", "parallel")
        ),
    )(xf)
    return out_flat.reshape(B, 3, H, W)


if __name__ == "__main__":
    root = jax.random.PRNGKey(0)
    k1, k2 = jax.random.split(root)
    eps = 1e-6

    # (1) Spec-shaped small input: auto path takes the fused-jnp fallback.
    B, C, H, W = 2, 4, 16, 16
    x = jax.random.normal(k1, (B, C, H, W), dtype=jnp.float32)
    ref = x[:, 0:1] / (x[:, 1:4] + eps)
    out = custom_div(x, eps)
    jax.block_until_ready(out)
    assert out.shape == (B, 3, H, W)
    assert jnp.allclose(out, ref, rtol=1e-6, atol=1e-6)

    # (2) Same small input, forcing the Pallas path (grid (2, 2), T=128).
    out_p = custom_div(x, eps, use_pallas=True)
    jax.block_until_ready(out_p)
    assert out_p.shape == (B, 3, H, W)
    assert jnp.allclose(out_p, ref, rtol=1e-6, atol=1e-6)

    # (3) Ragged spatial size (N=8000, T=1024, 8 tiles, clipped last block):
    #     exercises the pad/slice-free ragged handling.
    B2, H2, W2 = 1, 40, 200
    x2 = jax.random.normal(k2, (B2, 4, H2, W2), dtype=jnp.float32)
    ref2 = x2[:, 0:1] / (x2[:, 1:4] + eps)
    out2 = custom_div(x2, eps, use_pallas=True)
    jax.block_until_ready(out2)
    assert out2.shape == (B2, 3, H2, W2)
    assert jnp.allclose(out2, ref2, rtol=1e-6, atol=1e-6)

    print("KERNEL_OK")
</pallas_src>

<mosaic_0001>
module attributes {stable_mosaic.version = 11 : i64} {
  func.func @_custom_div_kernel(%arg0: i32, %arg1: i32, %arg2: memref<1x4x128xf32, #tpu.memory_space<vmem>>, %arg3: memref<1x3x128xf32, #tpu.memory_space<vmem>>) attributes {dimension_semantics = [#tpu.dimension_semantics<parallel>, #tpu.dimension_semantics<parallel>], iteration_bounds = array<i64: 2, 2>, scalar_prefetch = 0 : i64, scratch_operands = 0 : i64, tpu.core_type = #tpu.core_type<tc>, window_params = [{transform_indices = @transform_0, window_bounds = array<i64: 1, 4, 128>}, {transform_indices = @transform_1, window_bounds = array<i64: 1, 3, 128>}]} {
    %c0 = arith.constant 0 : index
    %c0_0 = arith.constant 0 : index
    %c0_1 = arith.constant 0 : index
    %0 = vector.load %arg2[%c0, %c0_0, %c0_1] : memref<1x4x128xf32, #tpu.memory_space<vmem>>, vector<1x4x128xf32>
    %1 = vector.extract_strided_slice %0 {offsets = [0, 0, 0], sizes = [1, 1, 128], strides = [1, 1, 1]} : vector<1x4x128xf32> to vector<1x1x128xf32>
    %2 = vector.extract_strided_slice %0 {offsets = [0, 1, 0], sizes = [1, 3, 128], strides = [1, 1, 1]} : vector<1x4x128xf32> to vector<1x3x128xf32>
    %cst = arith.constant 9.99999997E-7 : f32
    %3 = vector.broadcast %cst : f32 to vector<1x3x128xf32>
    %4 = arith.addf %2, %3 : vector<1x3x128xf32>
    %5 = vector.broadcast %1 : vector<1x1x128xf32> to vector<1x3x128xf32>
    %6 = arith.divf %5, %4 : vector<1x3x128xf32>
    %c0_2 = arith.constant 0 : index
    %c0_3 = arith.constant 0 : index
    %c0_4 = arith.constant 0 : index
    %7 = vector.load %arg3[%c0_2, %c0_3, %c0_4] : memref<1x3x128xf32, #tpu.memory_space<vmem>>, vector<1x3x128xf32>
    tpu.vector_store %arg3[%c0_2, %c0_3, %c0_4], %6 {strides = array<i32>} : memref<1x3x128xf32, #tpu.memory_space<vmem>>, vector<1x3x128xf32>,
    return
  }
  func.func @transform_0(%arg0: i32, %arg1: i32) -> (i32, i32, i32) {
    %c0_i32 = arith.constant 0 : i32
    %c0_i32_0 = arith.constant 0 : i32
    return %arg0, %c0_i32, %arg1 : i32, i32, i32
  }
  func.func @transform_1(%arg0: i32, %arg1: i32) -> (i32, i32, i32) {
    %c0_i32 = arith.constant 0 : i32
    %c0_i32_0 = arith.constant 0 : i32
    return %arg0, %c0_i32, %arg1 : i32, i32, i32
  }
}

</mosaic_0001>

<bundles_post_ra>
// kernel: tpu_custom_call.1
= control target key start
LH: loop header
LB: loop body
LE: loop exit
PB: predicated region body
PF: predicated region fallthrough
CT: control target
= control target key end

     0   :  { %6 = vsyncpa [#allocation3], 0  ;;  %s608_s0 = inlined_call_operand.hbm [shape: f32[2,4,256], index: 0, kind: input, shape index: {}]   ;;  %s609_s1 = inlined_call_operand.vmem [shape: f32[2,3,256], index: 1, kind: output, shape index: {}]  }
   0x1   :  { %8 = vsyncpa [#allocation3 + $0x1], 0  ;;  %s456_s6 = smov 0   ;;  %s458_s7 = smov 0  }
   0x2   :  { %s460_s8 = smov 0   ;;  %s462_s9 = smov 0  }
   0x3   :  { %s464_s10 = smov 0   ;;  %s466_s11 = smov 0  }
   0x4   :  { %s468_s12 = smov 0   ;;  %s470_s13 = smov 0  }
   0x5 LB: > { %s261_s14 = sadd.s32 4294967295, %s443_s13   ;;  %s23_s15 = sadd.s32 1, %s435_s11  ;;  %s443_s13 = sphi %s470_s13, %s14_s13   ;;  %s439_s12 = sphi %s468_s12, %s621_s12   ;;  %s435_s11 = sphi %s466_s11, %s620_s11   ;;  %s431_s10 = sphi %s464_s10, %s619_s10   ;;  %s427_s9 = sphi %s462_s9, %s618_s9   ;;  %s423_s8 = sphi %s460_s8, %s617_s8   ;;  %s419_s7 = sphi %s458_s7, %s616_s7   ;;  %s415_s6 = sphi %s456_s6, %s615_s6  }
   0x6   : > { %p24_p0 = scmp.ge.s32.totalorder %s23_s15, 2  ;;  %s26_s16 = sadd.s32 1, %s439_s12 }
   0x7   : > { %s35_s17 = sadd.s32 1, %s423_s8  ;;  %p42_p1 = scmp.ne.s32.totalorder %s423_s8, %s419_s7 }
   0x8   : > { %s623_s15 = smov (%p24_p0, %s23_s15), 0  ;;  %s625_s16 = smov (!%p24_p0, %s26_s16), %s439_s12 }
   0x9   : > { %s31_s18 = ssub.s32 %s435_s11, %s623_s15  ;;  %p43_p2 = scmp.eq.s32.totalorder %s443_s13, 0 }
   0xa   : > { %p28_p3 = scmp.ge.s32.totalorder %s625_s16, 2  ;;  %p48_p4 = scmp.ne.s32.totalorder %s419_s7, %s415_s6 }
   0xb   : > { %p507_p5 = por %p43_p2, %p42_p1  ;;  %p49_p6 = scmp.eq.s32.totalorder %s261_s14, 0 }
   0xc   : > { %s627_s16 = smov (%p28_p3, %s625_s16), 0  ;;  %p280_p8 = scmp.lt.s32.totalorder %s443_s13, 4 }
   0xd   : > { %p513_p7 = por %p49_p6, %p48_p4  ;;  %s30_s21 = ssub.s32 %s439_s12, %s627_s16 }
   0xe   : > { %s32_s22 = sor.u32 %s31_s18, %s30_s21  ;;  %s100_s23 = sand.u32 1, %s423_s8  }
   0xf   : > { %p33_p9 = scmp.eq.s32.totalorder %s32_s22, 0  ;;  %s265_s24 = sshll.u32 %s100_s23, 2 }
  0x10   : > { %s266_s25 = sshll.u32 %s439_s12, 1  ;;  %s104_s29 = scalar_lea.vmem [#allocation2], %s265_s24 }
  0x11   : > { %s523_s26 = scalar_select %p33_p9, %s423_s8, %s35_s17  }
  0x12   : > { %s109_s27 = sadd.s32 %s435_s11, %s266_s25  ;;  %s113_s30 = sshll.u32 %s104_s29, 4  ;;  %s531_s30 = int_to_ptr.vmem [resolvable:$true] %s113_s30 }
  0x13   : > { %s267_s28 = sshll.u32 %s109_s27, 6  ;;  %p537_p10 = pnand %p280_p8, %p507_p5 }
  0x14   : > { %s529_s4 = scalar_lea.hbm %s608_s0, %s267_s28  ;;  %s101_s6 = scalar_lea.sflag [#allocation3], %s100_s23 }
  0x15   : > { %s347_s14 = scalar_lea.hbm %s529_s4, 64  ;;  %p349_p0 = pneg %p537_p10 }
  0x16   : > { %p348_p13 = scmp.ne.s32.totalorder %s529_s4, %s347_s14  ;;  %s352_s19 = scalar_lea.hbm %s608_s0, 256 }
  0x17   : > { %p353_p3 = scmp.lt.u32.totalorder %s529_s4, %s608_s0  ;;  %p354_p4 = scmp.lt.u32.totalorder %s352_s19, %s347_s14 }
  0x18   : > { %p350_p1 = pnand %p349_p0, %p348_p13  ;;  %p356_p6 = scmp.lt.u32.totalorder %s347_s14, %s529_s4 }
  0x19   : > { %p355_p5 = por %p354_p4, %p353_p3 }
  0x1a   : > { %p351_p2 = pneg %p350_p1 }
  0x1b   : > { %p357_p8 = por %p356_p6, %p355_p5 }
  0x1d   : > { %p358_p9 = pnand %p357_p8, %p351_p2 }
  0x1f   : > { %361 = shalt.err (!%p358_p9)
}
  0x20   : > { %s362_s23 = scalar_lea.vmem %s531_s30, 64  ;;  %s445_s24 = smov [#allocation2]  }
  0x21   : > { %p363_p13 = scmp.ne.s32.totalorder %s531_s30, %s362_s23  ;;  %s367_s25 = sshll.u32 %s445_s24, 4  ;;  %s368_s25 = int_to_ptr.vmem [resolvable:$false] %s367_s25 }
  0x22   : > { %s369_s27 = scalar_lea.vmem %s368_s25, 128  ;;  %p370_p12 = scmp.lt.s32.totalorder %s531_s30, %s368_s25 }
  0x23   : > { %p365_p1 = pnand %p363_p13, %p349_p0  ;;  %p371_p3 = scmp.lt.s32.totalorder %s369_s27, %s362_s23 }
  0x25   : > { %p366_p11 = pneg %p365_p1  ;;  %p372_p4 = por %p371_p3, %p370_p12 }
  0x27   : > { %p373_p5 = pnand %p372_p4, %p366_p11 }
  0x29   : > { %376 = shalt.err (!%p373_p5)
}
  0x2a   : > { %279 = dma.hbm_to_vmem [thread:$0]  (!%p537_p10), %s529_s4, 64, %s531_s30, %s101_s6  }
  0x2b   : > { %p613_p2 = scmp.lt.s32.totalorder %s443_s13, 5  ;;  %p614_p6 = scmp.ge.s32.totalorder %s443_s13, 1 }
  0x2d   : > { %p119_p0 = pnand %p614_p6, %p613_p2 }
  0x2e   : > { %s124_s28 = sand.u32 (!%p119_p0), 1, %s419_s7  }
  0x2f   : > { %122 = sbr.rel (%p119_p0) target bundleno = 72 (0x48), region = 24  ;;  %s269_s29 = sshll.u32 (!%p119_p0), %s124_s28, 2 }
  0x30   : > { %s125_s2 = scalar_lea.sflag (!%p119_p0), [#allocation3], %s124_s28  ;;  %s128_s3 = scalar_lea.vmem (!%p119_p0), [#allocation2], %s269_s29 }
  0x36   : > { %410 = dma.done.wait (%p513_p7), %s125_s2, 64  }
  0x37   : > { %412 = vsyncadd (%p513_p7), %s125_s2, 4294967232  ;;  %p150_p10 = scmp.lt.s32.totalorder %s431_s10, 1  ;;  %v160_v0 = vlaneseq  ;;  %p152_p11 = scmp.lt.s32.totalorder %s427_s9, 1  ;;  %v158_v1 = vld [vmem:[%s128_s3] sm:$0xf] }
  0x38   : > { %v159_v2 = vadd.f32 1e-06, %v158_v1 }
  0x39   : > { %s629_s10 = smov (!%p150_p10, %s431_s10), 1  ;;  %v161_v3 = vshrl.u32 %v160_v0, 7  ;;  %s631_s9 = smov (!%p152_p11, %s427_s9), 1 }
  0x3a   : > { %345 = vrcp.f32 %v159_v2  ;;  %s270_s30 = sshll.u32 %s629_s10, 1 }
  0x3b   : > { %v162_v4 = vsub.s32 0, %v161_v3  ;;  %s155_s4 = sadd.s32 %s270_s30, %s631_s9 }
  0x3c   : > { %s271_s5 = sshll.u32 %s155_s4, 2 }
  0x3d   : > { %v163_v5 = vrot.slane %v158_v1, %v162_v4  ;;  %s157_s14 = scalar_lea.vmem %s609_s1, %s271_s5 }
  0x44   : > { %v346_v6 = vpop.eup %345 }
  0x45   : > { %v165_v7 = vmul.f32 %v346_v6, %v163_v5 }
  0x47   : > { %166 = vst [vmem:[%s157_s14 - $0x1] sm:$0xe] %v165_v7 }
  0x48 PF: > { %s14_s13 = sadd.s32 1, %s443_s13   ;;  %s615_s6 = smov %s419_s7 }
  0x49   : > { %p11_p7 = scmp.ge.s32.totalorder %s14_s13, 6   ;;  %s616_s7 = smov %s423_s8 }
  0x4a   : > { %s617_s8 = smov %s523_s26  ;;  %s618_s9 = smov %s435_s11 }
  0x4b   : > { %s619_s10 = smov %s439_s12  ;;  %s620_s11 = smov %s623_s15 }
  0x4c   : > { %s621_s12 = smov %s627_s16  ;;  %13 = sbr.rel (!%p11_p7) target bundleno = 5 (0x5), region = 64 }
  0x53   :  { %194 = vsyncpa [#allocation3], 1 }
  0x54   :  { %196 = vsyncpa [#allocation3 + $0x1], 1 }

</bundles_post_ra>
